<compile_context>
chip_gen: v6e
topology: v6e:2x2x1
jax: 0.10.0
libtpu: 0.0.40
codegen_flags: <defaults>
</compile_context>

<pallas_src>
import functools

import jax
import jax.numpy as jnp
from jax.experimental import pallas as pl
from jax.experimental.pallas import tpu as pltpu


def _round_up(x, m):
    return ((x + m - 1) // m) * m


def _cdiv(a, b):
    return (a + b - 1) // b


# --------------------------------------------------------------------------
# Kernel 1: XW = dinv[:, None] * (X @ W1), computed once, stored in bf16.
# --------------------------------------------------------------------------
def project_kernel(x_ref, w1_ref, dinv_ref, out_ref):
    xw = jnp.dot(x_ref[...], w1_ref[...], preferred_element_type=jnp.float32)
    out_ref[...] = (xw * dinv_ref[...]).astype(out_ref.dtype)


# --------------------------------------------------------------------------
# Kernel 2: tiled aggregation + finalize.
#   acc[i] = sum_k A[i, k] @ XW[k]        (int8 A upcast to bf16, f32 acc)
#   out[i] = tanh(acc[i] * dinv[i] + b1) @ W2 + b2
# --------------------------------------------------------------------------
def qnet_agg_kernel(a_ref, xw_ref, dinv_ref, b1_ref, w2_ref, b2_ref,
                    out_ref, acc_ref, *, tk, xw_resident):
    k = pl.program_id(1)

    @pl.when(k == 0)
    def _():
        acc_ref[...] = jnp.zeros_like(acc_ref)

    # int8 HBM stream -> bf16 MXU operand (VPU upcast is free under DMA bound).
    a_tile = a_ref[...].astype(jnp.bfloat16)
    if xw_resident:
        # XW lives fully in VMEM; slice the k-th contraction slab.
        xw_tile = xw_ref[pl.ds(pl.multiple_of(k * tk, 128), tk), :]
    else:
        xw_tile = xw_ref[...]
    acc_ref[...] += jnp.dot(a_tile, xw_tile, preferred_element_type=jnp.float32)

    @pl.when(k == pl.num_programs(1) - 1)
    def _():
        # f32 elementwise epilogue (v5e VPU/EUP have no native bf16).
        h = jnp.tanh(acc_ref[...] * dinv_ref[...] + b1_ref[...])
        y = jnp.dot(h.astype(jnp.bfloat16), w2_ref[...],
                    preferred_element_type=jnp.float32)
        out_ref[...] = (y + b2_ref[...]).astype(out_ref.dtype)


# --------------------------------------------------------------------------
# Wrapper
# --------------------------------------------------------------------------
def qnet_forward(x, edge_index, w1, b1, w2, b2, *, tile=512,
                 xw_resident_budget=32 * 1024 * 1024):
    """Pallas implementation of QNet.forward.

    x:          [N, n_obs] float32 node features
    edge_index: [2, E] int32, edge_index[0]=source, edge_index[1]=target
    w1:         [n_obs, n_mid]    (GCNConv weight, already transposed)
    b1:         [n_mid]           (GCNConv bias)
    w2:         [n_mid, n_action] (fc1 weight, already transposed)
    b2:         [n_action]        (fc1 bias)
    returns:    [N, n_action] float32
    """
    n, n_obs = x.shape
    n_mid = w1.shape[1]
    n_action = w2.shape[1]

    # Tile size: as large as the (128-rounded) problem allows, up to `tile`.
    tile = max(128, _round_up(min(tile, _round_up(n, 128)), 128))
    row_tiles = _cdiv(n, tile)
    # v7x has 2 TensorCores: keep an even number of row tiles (when >1) so the
    # "parallel" row axis shards evenly across both cores.
    if row_tiles > 1 and row_tiles % 2 == 1:
        row_tiles += 1
    n_pad = row_tiles * tile

    obs_pad = _round_up(n_obs, 128)
    mid_pad = _round_up(n_mid, 128)
    act_pad = _round_up(n_action, 128)

    # ---- glue: int8 adjacency (A + I) + D^{-1/2} vector ----
    # One scatter over (edges + self-loops); degrees via segment_sum so we never
    # row-reduce the N^2 array.
    src = edge_index[0].astype(jnp.int32)
    dst = edge_index[1].astype(jnp.int32)
    loops = jnp.arange(n, dtype=jnp.int32)
    all_dst = jnp.concatenate([dst, loops])
    all_src = jnp.concatenate([src, loops])
    # TODO(synk): scatter straight into int8 once int8 scatter-add is verified on
    # all target TPU gens; int32 scatter + exact downcast is the safe path.
    adj = jnp.zeros((n_pad, n_pad), jnp.int32).at[all_dst, all_src].add(1)
    adj_i8 = adj.astype(jnp.int8)                       # values 0/1/2 -> exact
    deg = jax.ops.segment_sum(
        jnp.ones(all_dst.shape[0], jnp.float32), all_dst, num_segments=n_pad)
    dinv = jnp.where(deg > 0, jax.lax.rsqrt(deg), 0.0)
    dinv_2d = dinv.reshape(n_pad, 1).astype(jnp.float32)

    # ---- zero-pad params / features (bf16 MXU operands, f32 biases) ----
    x_p = jnp.zeros((n_pad, obs_pad), jnp.bfloat16).at[:n, :n_obs].set(
        x.astype(jnp.bfloat16))
    w1_p = jnp.zeros((obs_pad, mid_pad), jnp.bfloat16).at[:n_obs, :n_mid].set(
        w1.astype(jnp.bfloat16))
    b1_p = jnp.zeros((1, mid_pad), jnp.float32).at[0, :n_mid].set(
        b1.astype(jnp.float32))
    w2_p = jnp.zeros((mid_pad, act_pad), jnp.bfloat16).at[:n_mid, :n_action].set(
        w2.astype(jnp.bfloat16))
    b2_p = jnp.zeros((1, act_pad), jnp.float32).at[0, :n_action].set(
        b2.astype(jnp.float32))

    # ---- kernel 1: dinv-scaled projection XW (computed once) ----
    xw = pl.pallas_call(
        project_kernel,
        out_shape=jax.ShapeDtypeStruct((n_pad, mid_pad), jnp.bfloat16),
        grid_spec=pltpu.PrefetchScalarGridSpec(
            num_scalar_prefetch=0,
            grid=(n_pad // tile,),
            in_specs=[
                pl.BlockSpec((tile, obs_pad), lambda i: (i, 0)),
                pl.BlockSpec((obs_pad, mid_pad), lambda i: (0, 0)),
                pl.BlockSpec((tile, 1), lambda i: (i, 0)),
            ],
            out_specs=pl.BlockSpec((tile, mid_pad), lambda i: (i, 0)),
        ),
        compiler_params=pltpu.CompilerParams(
            dimension_semantics=("parallel",)),
    )(x_p, w1_p, dinv_2d)

    # ---- kernel 2: tiled aggregation + tanh + fc1 ----
    # Keep XW fully VMEM-resident when it fits (removes the XW re-read stream);
    # otherwise stream (tile, mid_pad) slabs.
    xw_bytes = n_pad * mid_pad * 2
    working_set = (2 * xw_bytes                  # resident XW (assume 2 bufs)
                   + 2 * tile * tile             # A int8 tiles, double-buffered
                   + 2 * tile * act_pad * 4      # out f32, double-buffered
                   + tile * mid_pad * 4          # f32 accumulator
                   + 2 * mid_pad * act_pad * 2   # w2 bf16
                   + 2 * (tile + mid_pad + act_pad) * 4)
    xw_resident = working_set <= xw_resident_budget
    if xw_resident:
        xw_spec = pl.BlockSpec((n_pad, mid_pad), lambda i, k: (0, 0))
        # v7x: physical VMEM is 64 MiB -> never raise past ~48 MiB.
        vmem_limit = int(min(48 * 1024 * 1024,
                             max(32 * 1024 * 1024, working_set + (8 << 20))))
    else:
        xw_spec = pl.BlockSpec((tile, mid_pad), lambda i, k: (k, 0))
        vmem_limit = 48 * 1024 * 1024

    grid = (row_tiles, n_pad // tile)
    flops = 2 * n_pad * n_pad * mid_pad + 2 * n_pad * mid_pad * act_pad
    xw_read = xw_bytes if xw_resident else row_tiles * n_pad * mid_pad * 2
    bytes_accessed = (n_pad * n_pad                      # A (int8)
                      + xw_read
                      + mid_pad * act_pad * 2
                      + n_pad * act_pad * 4)

    out_p = pl.pallas_call(
        functools.partial(qnet_agg_kernel, tk=tile, xw_resident=xw_resident),
        out_shape=jax.ShapeDtypeStruct((n_pad, act_pad), jnp.float32),
        grid_spec=pltpu.PrefetchScalarGridSpec(
            num_scalar_prefetch=0,
            grid=grid,
            in_specs=[
                pl.BlockSpec((tile, tile), lambda i, k: (i, k)),        # A tile
                xw_spec,                                                # XW
                pl.BlockSpec((tile, 1), lambda i, k: (i, 0)),           # dinv
                pl.BlockSpec((1, mid_pad), lambda i, k: (0, 0)),        # b1
                pl.BlockSpec((mid_pad, act_pad), lambda i, k: (0, 0)),  # w2
                pl.BlockSpec((1, act_pad), lambda i, k: (0, 0)),        # b2
            ],
            out_specs=pl.BlockSpec((tile, act_pad), lambda i, k: (i, 0)),
            scratch_shapes=[pltpu.VMEM((tile, mid_pad), jnp.float32)],
        ),
        compiler_params=pltpu.CompilerParams(
            dimension_semantics=("parallel", "arbitrary"),
            vmem_limit_bytes=vmem_limit),
        cost_estimate=pl.CostEstimate(
            flops=flops,
            transcendentals=n_pad * mid_pad,
            bytes_accessed=int(bytes_accessed)),
    )(adj_i8, xw, dinv_2d, b1_p, w2_p, b2_p)

    return out_p[:n, :n_action]


# --------------------------------------------------------------------------
# Pure-JAX reference (same math as torch_geometric GCNConv + Linear), f32.
# --------------------------------------------------------------------------
def qnet_reference(x, edge_index, w1, b1, w2, b2):
    n = x.shape[0]
    src, dst = edge_index[0], edge_index[1]
    adj = jnp.zeros((n, n), dtype=jnp.float32).at[dst, src].add(1.0)
    adj = adj + jnp.eye(n, dtype=jnp.float32)
    deg = adj.sum(axis=1)
    dinv = jnp.where(deg > 0, jax.lax.rsqrt(deg), 0.0)
    a_hat = dinv[:, None] * adj * dinv[None, :]
    h = a_hat @ (x @ w1) + b1[None, :]
    h = jnp.tanh(h)
    return h @ w2 + b2[None, :]


if __name__ == "__main__":
    key = jax.random.PRNGKey(0)
    k1, k2, k3, k4 = jax.random.split(key, 4)

    # Small shapes implied by QNet(n_obs, n_mid, n_action) on a graph of N nodes.
    N, n_obs, n_mid, n_action = 8, 16, 32, 4

    # Deterministic node features.
    x = jax.random.normal(k1, (N, n_obs), dtype=jnp.float32)

    # Deterministic small graph: bidirectional ring over N nodes.
    src = jnp.arange(N, dtype=jnp.int32)
    dst = jnp.roll(src, -1)
    edge_index = jnp.stack(
        [jnp.concatenate([src, dst]), jnp.concatenate([dst, src])], axis=0
    )  # [2, 2N]

    # Deterministic parameters (glorot-ish scale; synthetic, not a checkpoint).
    w1 = jax.random.normal(k2, (n_obs, n_mid), dtype=jnp.float32) * (1.0 / jnp.sqrt(n_obs))
    b1 = jnp.zeros((n_mid,), dtype=jnp.float32)          # GCNConv bias init is zeros
    w2 = jax.random.normal(k3, (n_mid, n_action), dtype=jnp.float32) * (1.0 / jnp.sqrt(n_mid))
    b2 = jax.random.normal(k4, (n_action,), dtype=jnp.float32) * 0.01

    out = qnet_forward(x, edge_index, w1, b1, w2, b2)
    out = jax.block_until_ready(out)

    ref = qnet_reference(x, edge_index, w1, b1, w2, b2)
    assert out.shape == (N, n_action)
    # bf16 MXU operands throughout (X, W1, XW, A-upcast, h, W2) -> loosened
    # tolerance vs the f32 reference.
    assert jnp.allclose(out, ref, atol=5e-2, rtol=5e-2), "mismatch vs reference"

    print("KERNEL_OK")
</pallas_src>

<mosaic_0001>
module attributes {stable_mosaic.version = 11 : i64} {
  func.func @project_kernel(%arg0: i32, %arg1: memref<128x128xbf16, #tpu.memory_space<vmem>>, %arg2: memref<128x128xbf16, #tpu.memory_space<vmem>>, %arg3: memref<128x1xf32, #tpu.memory_space<vmem>>, %arg4: memref<128x128xbf16, #tpu.memory_space<vmem>>) attributes {dimension_semantics = [#tpu.dimension_semantics<parallel>], iteration_bounds = array<i64: 1>, scalar_prefetch = 0 : i64, scratch_operands = 0 : i64, tpu.core_type = #tpu.core_type<tc>, window_params = [{transform_indices = @transform_0, window_bounds = array<i64: 128, 128>}, {pipeline_mode = #tpu.pipeline_mode<synchronous>, transform_indices = @transform_1, window_bounds = array<i64: 128, 128>}, {transform_indices = @transform_2, window_bounds = array<i64: 128, 1>}, {transform_indices = @transform_3, window_bounds = array<i64: 128, 128>}]} {
    %c0 = arith.constant 0 : index
    %c0_0 = arith.constant 0 : index
    %0 = vector.load %arg1[%c0, %c0_0] : memref<128x128xbf16, #tpu.memory_space<vmem>>, vector<128x128xbf16>
    %c0_1 = arith.constant 0 : index
    %c0_2 = arith.constant 0 : index
    %1 = vector.load %arg2[%c0_1, %c0_2] : memref<128x128xbf16, #tpu.memory_space<vmem>>, vector<128x128xbf16>
    %cst = arith.constant dense<0.000000e+00> : vector<128x128xf32>
    %2 = tpu.matmul %0, %1, %cst {dimension_numbers = #tpu.dot_dimension_numbers<[1], [0], [0], [1], [0, 0, 1, 1], [], []>} : vector<128x128xbf16>, vector<128x128xbf16>, vector<128x128xf32> -> vector<128x128xf32>
    %c0_3 = arith.constant 0 : index
    %c0_4 = arith.constant 0 : index
    %3 = vector.load %arg3[%c0_3, %c0_4] : memref<128x1xf32, #tpu.memory_space<vmem>>, vector<128x1xf32>
    %4 = vector.broadcast %3 : vector<128x1xf32> to vector<128x128xf32>
    %5 = arith.mulf %2, %4 : vector<128x128xf32>
    %6 = arith.truncf %5 : vector<128x128xf32> to vector<128x128xbf16>
    %c0_5 = arith.constant 0 : index
    %c0_6 = arith.constant 0 : index
    %7 = vector.load %arg4[%c0_5, %c0_6] : memref<128x128xbf16, #tpu.memory_space<vmem>>, vector<128x128xbf16>
    tpu.vector_store %arg4[%c0_5, %c0_6], %6 {strides = array<i32>} : memref<128x128xbf16, #tpu.memory_space<vmem>>, vector<128x128xbf16>,
    return
  }
  func.func @transform_0(%arg0: i32) -> (i32, i32) {
    %c0_i32 = arith.constant 0 : i32
    %c0_i32_0 = arith.constant 0 : i32
    return %arg0, %c0_i32 : i32, i32
  }
  func.func @transform_1(%arg0: i32) -> (i32, i32) {
    %c0_i32 = arith.constant 0 : i32
    %c0_i32_0 = arith.constant 0 : i32
    %c0_i32_1 = arith.constant 0 : i32
    return %c0_i32, %c0_i32_0 : i32, i32
  }
  func.func @transform_2(%arg0: i32) -> (i32, i32) {
    %c0_i32 = arith.constant 0 : i32
    %c0_i32_0 = arith.constant 0 : i32
    return %arg0, %c0_i32 : i32, i32
  }
  func.func @transform_3(%arg0: i32) -> (i32, i32) {
    %c0_i32 = arith.constant 0 : i32
    %c0_i32_0 = arith.constant 0 : i32
    return %arg0, %c0_i32 : i32, i32
  }
}

</mosaic_0001>

<bundles_post_ra>
// kernel: tpu_custom_call.1
= control target key start
LH: loop header
LB: loop body
LE: loop exit
PB: predicated region body
PF: predicated region fallthrough
CT: control target
= control target key end

     0   :  { %v652_v2 = vmov 0   ;;  %s775_s0 = inlined_call_operand.vmem [shape: bf16[128,128], index: 0, kind: input, shape index: {}]   ;;  %s776_s1 = inlined_call_operand.vmem [shape: bf16[128,128], index: 1, kind: input, shape index: {}]   ;;  %s777_s2 = inlined_call_operand.vmem [shape: f32[128,1], index: 2, kind: input, shape index: {}]   ;;  %s778_s3 = inlined_call_operand.hbm [shape: bf16[128,128], index: 3, kind: output, shape index: {}]  }
   0x1   :  { %v614_v0 = vld [vmem:[%s776_s1 + $0x38] sm:$0xff]   ;;  %v615_v1 = vld [vmem:[%s776_s1 + $0x30] sm:$0xff]   ;;  %613 = vset.pattern.permute.xlu1 %v652_v2  ;;  %612 = vset.pattern.permute.xlu0 %v652_v2  ;;  %v616_v3 = vld [vmem:[%s776_s1 + $0x28] sm:$0xff]  }
   0x2   :  { %560 = vmatprep.subr.bf16.mxu0 %v614_v0  ;;  %592 = vmatprep.subr.bf16.mxu1 %v614_v0  ;;  %v617_v4 = vld [vmem:[%s776_s1 + $0x20] sm:$0xff]   ;;  %v618_v7 = vld [vmem:[%s776_s1 + $0x18] sm:$0xff]   ;;  %v619_v8 = vld [vmem:[%s776_s1 + $0x10] sm:$0xff]  }
   0x3   :  { %561 = vmatpush3.bf16.msra.mxu0 %v614_v0  ;;  %600 = vmatpush3.bf16.msra.mxu1 %v614_v0  ;;  %v622_v5 = vld [vmem:[%s775_s0] sm:$0xff]   ;;  %v243_v9 = vld [vmem:[%s777_s2 + $0x10] sm:$0xff]  ;;  %v244_v11 = vld [vmem:[%s777_s2 + $0x18] sm:$0xff] }
   0x4   :  { %562 = vmatprep.subr.bf16.mxu0 %v615_v1  ;;  %593 = vmatprep.subr.bf16.mxu1 %v615_v1  ;;  %v623_v6 = vld [vmem:[%s775_s0 + $0x20] sm:$0xff]   ;;  %v242_v12 = vld [vmem:[%s777_s2 + $0x8] sm:$0xff] }
   0x5   :  { %576 = vmatprep.mubr.bf16.mxu0 %v622_v5  ;;  %584 = vmatprep.mubr.bf16.mxu1 %v623_v6  ;;  %v241_v10 = vld [vmem:[%s777_s2] sm:$0xff]  ;;  %v620_v13 = vld [vmem:[%s776_s1 + $0x8] sm:$0xff]  }
   0x6   :  { %269 = vperm.xlu1 %613, %v243_v9   ;;  %259 = vperm.xlu0 %612, %v241_v10  }
   0x7   :  { %563 = vmatpush3.bf16.msra.mxu0 %v615_v1  ;;  %601 = vmatpush3.bf16.msra.mxu1 %v615_v1 }
   0x8   :  { %564 = vmatprep.subr.bf16.mxu0 %v616_v3  ;;  %594 = vmatprep.subr.bf16.mxu1 %v616_v3 }
   0xa   :  { %274 = vperm.xlu1 %613, %v244_v11   ;;  %264 = vperm.xlu0 %612, %v242_v12  }
   0xb   :  { %565 = vmatpush3.bf16.msra.mxu0 %v616_v3  ;;  %602 = vmatpush3.bf16.msra.mxu1 %v616_v3 }
   0xc   :  { %566 = vmatprep.subr.bf16.mxu0 %v617_v4  ;;  %595 = vmatprep.subr.bf16.mxu1 %v617_v4 }
   0xf   :  { %567 = vmatpush3.bf16.msra.mxu0 %v617_v4  ;;  %603 = vmatpush3.bf16.msra.mxu1 %v617_v4 }
  0x10   :  { %568 = vmatprep.subr.bf16.mxu0 %v618_v7  ;;  %596 = vmatprep.subr.bf16.mxu1 %v618_v7 }
  0x13   :  { %569 = vmatpush3.bf16.msra.mxu0 %v618_v7  ;;  %604 = vmatpush3.bf16.msra.mxu1 %v618_v7 }
  0x14   :  { %570 = vmatprep.subr.bf16.mxu0 %v619_v8  ;;  %597 = vmatprep.subr.bf16.mxu1 %v619_v8 }
  0x15   :  { %8 = vsyncpa [#allocation3], 0  ;;  %v246_v14 = vld [vmem:[%s777_s2 + $0x28] sm:$0xff]  ;;  %v245_v15 = vld [vmem:[%s777_s2 + $0x20] sm:$0xff] }
  0x16   :  { %v621_v16 = vld [vmem:[%s776_s1] sm:$0xff]   ;;  %284 = vperm.xlu1 %613, %v246_v14   ;;  %279 = vperm.xlu0 %612, %v245_v15   ;;  %v248_v17 = vld [vmem:[%s777_s2 + $0x38] sm:$0xff]  ;;  %v247_v18 = vld [vmem:[%s777_s2 + $0x30] sm:$0xff] }
  0x17   :  { %571 = vmatpush3.bf16.msra.mxu0 %v619_v8  ;;  %605 = vmatpush3.bf16.msra.mxu1 %v619_v8  ;;  %v624_v19 = vld [vmem:[%s775_s0 + $0x8] sm:$0xff]   ;;  %v249_v22 = vld [vmem:[%s777_s2 + $0x40] sm:$0xff]  ;;  %v626_v23 = vld [vmem:[%s775_s0 + $0x10] sm:$0xff]  }
  0x18   :  { %572 = vmatprep.subr.bf16.mxu0 %v620_v13  ;;  %598 = vmatprep.subr.bf16.mxu1 %v620_v13  ;;  %v625_v20 = vld [vmem:[%s775_s0 + $0x28] sm:$0xff]   ;;  %v627_v24 = vld [vmem:[%s775_s0 + $0x30] sm:$0xff]   ;;  %v252_v25 = vld [vmem:[%s777_s2 + $0x58] sm:$0xff] }
  0x19   :  { %v250_v21 = vld [vmem:[%s777_s2 + $0x48] sm:$0xff]  ;;  %v251_v26 = vld [vmem:[%s777_s2 + $0x50] sm:$0xff]  ;;  %v628_v27 = vld [vmem:[%s775_s0 + $0x18] sm:$0xff]  }
  0x1a   :  { %294 = vperm.xlu1 %613, %v248_v17   ;;  %289 = vperm.xlu0 %612, %v247_v18   ;;  %v629_v28 = vld [vmem:[%s775_s0 + $0x38] sm:$0xff]   ;;  %v254_v29 = vld [vmem:[%s777_s2 + $0x68] sm:$0xff]  ;;  %v253_v30 = vld [vmem:[%s777_s2 + $0x60] sm:$0xff]  ;;  %s653_s0 = smov [#allocation2]  }
  0x1b   :  { %573 = vmatpush3.bf16.msra.mxu0 %v620_v13  ;;  %606 = vmatpush3.bf16.msra.mxu1 %v620_v13  ;;  %v256_v31 = vld [vmem:[%s777_s2 + $0x78] sm:$0xff]  ;;  %v255_v32 = vld [vmem:[%s777_s2 + $0x70] sm:$0xff]  ;;  %s438_s2 = sshll.u32 %s653_s0, 4  ;;  %s439_s2 = int_to_ptr.vmem [resolvable:$true] %s438_s2 }
  0x1c   :  { %574 = vmatprep.subr.bf16.mxu0 %v621_v16  ;;  %599 = vmatprep.subr.bf16.mxu1 %v621_v16  ;;  %s630_s21 = scalar_lea.vmem %s439_s2, 1024  ;;  %p635_p1 = scmp.lt.s32.totalorder %s439_s2, %s439_s2 }
  0x1d   :  { %p631_p0 = scmp.ne.s32.totalorder %s439_s2, %s630_s21  ;;  %p636_p2 = scmp.lt.s32.totalorder %s630_s21, %s630_s21 }
  0x1e   :  { %304 = vperm.xlu1 %613, %v250_v21   ;;  %299 = vperm.xlu0 %612, %v249_v22  }
  0x1f   :  { %575 = vmatpush3.bf16.msra.mxu0 %v621_v16  ;;  %607 = vmatpush3.bf16.msra.mxu1 %v621_v16  ;;  %p637_p3 = por %p636_p2, %p635_p1 }
  0x21   :  { %p638_p4 = pnand %p637_p3, %p631_p0 }
  0x22   :  { %577 = vmatmul.mubr.bf16.vlgmr.msra.gmra.mxu0 %v624_v19  ;;  %585 = vmatmul.mubr.bf16.vlgmr.msra.gmra.mxu1 %v625_v20 }
  0x23   :  { %580 = vmatprep.mubr.bf16.mxu0 %v626_v23  ;;  %588 = vmatprep.mubr.bf16.mxu1 %v627_v24 }
  0x24   :  { %314 = vperm.xlu1 %613, %v252_v25   ;;  %309 = vperm.xlu0 %612, %v251_v26  }
  0x28   :  { %324 = vperm.xlu1 %613, %v254_v29   ;;  %319 = vperm.xlu0 %612, %v253_v30  }
  0x2a   :  { %581 = vmatmul.mubr.bf16.gmra.mxu0 %v628_v27  ;;  %589 = vmatmul.mubr.bf16.gmra.mxu1 %v629_v28 }
  0x2c   :  { %334 = vperm.xlu1 %613, %v256_v31   ;;  %329 = vperm.xlu0 %612, %v255_v32  }
  0x81   :  { %v270_v33 = vpop.permute.xlu1 %269  ;;  %v260_v34 = vpop.permute.xlu0 %259 }
  0x85   :  { %v275_v35 = vpop.permute.xlu1 %274  ;;  %v265_v36 = vpop.permute.xlu0 %264 }
  0x91   :  { %v285_v37 = vpop.permute.xlu1 %284  ;;  %v280_v38 = vpop.permute.xlu0 %279 }
  0x95   :  { %v295_v39 = vpop.permute.xlu1 %294  ;;  %v290_v40 = vpop.permute.xlu0 %289 }
  0x99   :  { %v305_v41 = vpop.permute.xlu1 %304  ;;  %v300_v42 = vpop.permute.xlu0 %299 }
  0x9f   :  { %v315_v43 = vpop.permute.xlu1 %314  ;;  %v310_v44 = vpop.permute.xlu0 %309 }
  0xa3   :  { %v325_v51 = vpop.permute.xlu1 %324  ;;  %v320_v52 = vpop.permute.xlu0 %319 }
  0xa7   :  { %v335_v7 = vpop.permute.xlu1 %334  ;;  %v330_v8 = vpop.permute.xlu0 %329 }
  0xe2   :  { %v578_v45 = vpop.f32.mrf.mxu0  ;;  %v586_v46 = vpop.f32.mrf.mxu1 }
  0xe3   :  { %v339_v53 = vmul.f32 %v578_v45, %v270_v33  ;;  %v347_v54 = vmul.f32 %v586_v46, %v310_v44 }
  0xe4   :  { %v178_v47 = vpop.f32.mrf.mxu0  ;;  %v210_v48 = vpop.f32.mrf.mxu1 }
  0xe5   :  { %v337_v57 = vmul.f32 %v260_v34, %v178_v47  ;;  %v345_v58 = vmul.f32 %v300_v42, %v210_v48 }
  0xe6   :  { %v579_v49 = vpop.f32.mrf.mxu0  ;;  %v587_v50 = vpop.f32.mrf.mxu1 }
  0xe7   :  { %v340_v55 = vmul.f32 %v579_v49, %v275_v35  ;;  %v348_v56 = vmul.f32 %v587_v50, %v315_v43 }
  0xe8   :  { %v181_v59 = vpop.f32.mrf.mxu0  ;;  %v213_v60 = vpop.f32.mrf.mxu1 }
  0xe9   :  { %v505_v61 = vpack.c.bf16 %v340_v55, %v339_v53  ;;  %v525_v62 = vpack.c.bf16 %v348_v56, %v347_v54  ;;  %v338_v63 = vmul.f32 %v265_v36, %v181_v59  ;;  %v346_v0 = vmul.f32 %v305_v41, %v213_v60 }
  0xea   :  { %v582_v1 = vpop.f32.mrf.mxu0  ;;  %v590_v2 = vpop.f32.mrf.mxu1 }
  0xeb   :  { %537 = vst [vmem:[#allocation2 + $0x8] sm:$0xff] %v505_v61   ;;  %541 = vst [vmem:[#allocation2 + $0x28] sm:$0xff] %v525_v62   ;;  %v500_v3 = vpack.c.bf16 %v338_v63, %v337_v57  ;;  %v520_v4 = vpack.c.bf16 %v346_v0, %v345_v58  ;;  %v343_v11 = vmul.f32 %v582_v1, %v290_v40 }
  0xec   :  { %v194_v5 = vpop.f32.mrf.mxu0  ;;  %v226_v6 = vpop.f32.mrf.mxu1  ;;  %v351_v12 = vmul.f32 %v590_v2, %v330_v8 }
  0xed   :  { %501 = vst [vmem:[#allocation2] sm:$0xff] %v500_v3   ;;  %540 = vst [vmem:[#allocation2 + $0x20] sm:$0xff] %v520_v4   ;;  %v341_v15 = vmul.f32 %v280_v38, %v194_v5  ;;  %v349_v16 = vmul.f32 %v320_v52, %v226_v6 }
  0xee   :  { %v583_v9 = vpop.f32.mrf.mxu0  ;;  %v591_v10 = vpop.f32.mrf.mxu1 }
  0xef   :  { %v344_v13 = vmul.f32 %v583_v9, %v295_v39  ;;  %v352_v14 = vmul.f32 %v591_v10, %v335_v7 }
  0xf0   :  { %v197_v17 = vpop.f32.mrf.mxu0  ;;  %v229_v18 = vpop.f32.mrf.mxu1 }
  0xf1   :  { %v515_v19 = vpack.c.bf16 %v344_v13, %v343_v11  ;;  %v535_v20 = vpack.c.bf16 %v352_v14, %v351_v12  ;;  %v342_v21 = vmul.f32 %v285_v37, %v197_v17  ;;  %v350_v22 = vmul.f32 %v325_v51, %v229_v18 }
  0xf3   :  { %539 = vst [vmem:[#allocation2 + $0x18] sm:$0xff] %v515_v19   ;;  %543 = vst [vmem:[#allocation2 + $0x38] sm:$0xff] %v535_v20   ;;  %v510_v23 = vpack.c.bf16 %v342_v21, %v341_v15  ;;  %v530_v24 = vpack.c.bf16 %v350_v22, %v349_v16 }
  0xf5   :  { %538 = vst [vmem:[#allocation2 + $0x10] sm:$0xff] %v510_v23   ;;  %542 = vst [vmem:[#allocation2 + $0x30] sm:$0xff] %v530_v24  }
  0xf6   :  { %641 = shalt.err (!%p638_p4)
}
  0xf7   :  { %s654_s22 = smov 64   ;;  %s655_s1 = smov 4  }
  0xf8   :  { %444 = dma.vmem_to_hbm [thread:$0]  %s439_s2, 1024, %s778_s3, [#allocation3], %s654_s22, %s654_s22, %s655_s1  }
  0xf9   :  { %650 = dma.done.wait [#allocation3], 1024  }
  0xfa   :  { %651 = vsyncadd [#allocation3], 4294966272 }
  0xfb   :  { %448 = vsyncpa [#allocation3], 1 }

</bundles_post_ra>
